<compile_context>
chip_gen: v7x
topology: tpu7x:2x2x1
jax: 0.10.0
libtpu: 0.0.40
codegen_flags: <defaults>
</compile_context>

<pallas_src>
import jax
import jax.numpy as jnp
from jax.experimental import pallas as pl
from jax.experimental.pallas import tpu as pltpu


def _round_up(x, m):
    return ((x + m - 1) // m) * m


def _patch_embed_kernel(x_ref, w_ref, b_ref, o_ref):
    # x_ref: (tm, K) compute dtype; w_ref: (K, Epad) compute dtype;
    # b_ref: (1, Epad) f32; o_ref: (tm, Epad) out dtype.
    # f32 accumulation on the MXU; bias add fused in f32 (VPU slack under the
    # MXU-bound regime); single cast on the way out.
    acc = jnp.dot(x_ref[...], w_ref[...], preferred_element_type=jnp.float32)
    o_ref[...] = (acc + b_ref[...]).astype(o_ref.dtype)


def _vmem_budget_bytes():
    # ~75% of physical VMEM: ~48 MiB on v7x (64 MiB phys), ~96 MiB on
    # v5e/v6e (128 MiB phys).  Leaves headroom for compiler-internal scratch.
    phys = 64 * 1024 * 1024
    try:
        info = pltpu.get_tpu_info()
        phys = int(getattr(info, "vmem_capacity_bytes", phys)) or phys
    except Exception:
        pass
    return (phys * 3) // 4


def _pick_tile_m(m, tile_m):
    """MXU/bf16-friendly M tile: multiple of 256 (>=256), else 128, else 16."""
    if m <= 8:
        return m                       # full-dim block (legal even if < 8)
    if m < 16:
        return 8                       # grid of 2, ragged tail handled by Pallas
    tm = min(tile_m, m)
    tm -= tm % 16                      # bf16 packing tile is (16, 128)
    if tm >= 256:
        tm -= tm % 256                 # 2x256 MXU (v6e/v7x); also /128 for v5e
    elif tm >= 128:
        tm -= tm % 128                 # 4x128 MXU (v5e)
    return max(tm, 16)


def patch_embedding(x, weight, bias, patch_size, *,
                    compute_dtype=jnp.bfloat16, out_dtype=None, tile_m=1024):
    """Forward of PatchEmbedding: Conv2d(stride=kernel=P) -> flatten -> permute.

    x: (B, C, H, W) NCHW; weight: (E, C, P, P) OIHW conv weight; bias: (E,).
    Returns (B, num_patches, E).

    compute_dtype: MXU operand dtype (bf16 default; pass jnp.float32 for exact
      PyTorch-conv numerics at reduced MXU throughput).
    out_dtype: output dtype (default x.dtype; pass bf16 to halve writeback).
    """
    B, C, H, W = x.shape
    E = weight.shape[0]
    P = patch_size
    assert H % P == 0 and W % P == 0, "image size must be divisible by patch size"
    Hp, Wp = H // P, W // P
    Np = Hp * Wp
    K = C * P * P
    M = B * Np
    out_dtype = x.dtype if out_dtype is None else out_dtype

    # --- glue: one fused XLA cast + patch rearrange, NCHW -> (M, K), with K
    # ordered (c, ph, pw) to match the OIHW conv weight.
    # TODO(synk): fold this im2col into the kernel (grid over (B, Hp), DMA the
    # (C, P, W) row strip and swizzle in VMEM) to drop this extra HBM pass;
    # the required sub-lane-granularity relayout does not lower reliably in
    # Mosaic at small P/Wp, so it stays as a single fused XLA pass for now.
    xp = x.astype(compute_dtype)
    xp = xp.reshape(B, C, Hp, P, Wp, P).transpose(0, 2, 4, 1, 3, 5).reshape(M, K)

    # conv weight -> matmul weight (K, E); bias kept in f32 for the f32 add.
    w_mat = weight.reshape(E, K).T.astype(compute_dtype)
    b_mat = bias.reshape(1, E).astype(jnp.float32)

    n_pad = _round_up(E, 128)          # lane-dense output -> unmasked stores
    if n_pad != E:
        w_mat = jnp.pad(w_mat, ((0, 0), (0, n_pad - E)))
        b_mat = jnp.pad(b_mat, ((0, 0), (0, n_pad - E)))

    c_item = jnp.dtype(compute_dtype).itemsize
    o_item = jnp.dtype(out_dtype).itemsize
    budget = _vmem_budget_bytes()

    def vmem_needed(tm):
        # Pallas double-buffers every BlockSpec, including the constant-index
        # weight/bias specs, so count 2x for all of them.
        return 2 * (tm * K * c_item + K * n_pad * c_item
                    + n_pad * 4 + tm * n_pad * o_item)

    tm = _pick_tile_m(M, tile_m)
    # Shrink the M tile if the working set would exceed the VMEM budget.
    while vmem_needed(tm) > budget and tm > 256:
        tm = _pick_tile_m(M, tm // 2)
    grid_m = pl.cdiv(M, tm)
    # Keep both TensorCores busy (megacore) when there is enough work.
    if grid_m < 2 and M >= 512:
        tm = _round_up(pl.cdiv(M, 2), 256)
        grid_m = pl.cdiv(M, tm)

    vmem_limit = int(min(budget, max(int(1.3 * vmem_needed(tm)),
                                     32 * 1024 * 1024)))

    cost = pl.CostEstimate(
        flops=2 * M * K * n_pad,
        transcendentals=0,
        bytes_accessed=(M * K + K * n_pad) * c_item + M * n_pad * o_item,
    )

    out = pl.pallas_call(
        _patch_embed_kernel,
        out_shape=jax.ShapeDtypeStruct((M, n_pad), out_dtype),
        grid_spec=pltpu.PrefetchScalarGridSpec(
            num_scalar_prefetch=0,
            grid=(grid_m,),
            in_specs=[
                pl.BlockSpec((tm, K), lambda i: (i, 0)),      # streamed M tiles
                pl.BlockSpec((K, n_pad), lambda i: (0, 0)),   # resident weight
                pl.BlockSpec((1, n_pad), lambda i: (0, 0)),   # resident bias
            ],
            out_specs=pl.BlockSpec((tm, n_pad), lambda i: (i, 0)),
        ),
        compiler_params=pltpu.CompilerParams(
            dimension_semantics=("parallel",),    # megacore split over M tiles
            vmem_limit_bytes=vmem_limit,
        ),
        cost_estimate=cost,
    )(xp, w_mat, b_mat)

    if n_pad != E:
        out = out[:, :E]
    # (B*Np, E) -> (B, Np, E) == conv -> flatten(2,3) -> permute(0, 2, 1).
    return out.reshape(B, Np, E)


if __name__ == "__main__":
    # Small shapes consistent with the module: batch=2, channels=4,
    # spatial=16, patch=8 -> num_patches=4, embedding_dim=32.
    B, C, H, W = 2, 4, 16, 16
    P, E = 8, 32

    key = jax.random.PRNGKey(0)
    kx, kw, kb = jax.random.split(key, 3)
    x = jax.random.normal(kx, (B, C, H, W), dtype=jnp.float32)
    weight = jax.random.normal(kw, (E, C, P, P), dtype=jnp.float32) * 0.02
    bias = jax.random.normal(kb, (E,), dtype=jnp.float32) * 0.02

    out = patch_embedding(x, weight, bias, P)
    out = jax.block_until_ready(out)
    assert out.shape == (B, (H // P) * (W // P), E)

    # Reference 1: identical math (bf16 operands, f32 accumulation) in plain JAX.
    Hp, Wp = H // P, W // P
    xp_ref = (x.astype(jnp.bfloat16)
              .reshape(B, C, Hp, P, Wp, P)
              .transpose(0, 2, 4, 1, 3, 5)
              .reshape(B * Hp * Wp, C * P * P))
    w_ref = weight.reshape(E, C * P * P).T.astype(jnp.bfloat16)
    ref_bf16 = (jnp.dot(xp_ref, w_ref, preferred_element_type=jnp.float32)
                + bias[None, :]).reshape(B, Hp * Wp, E)
    assert jnp.allclose(out, ref_bf16, atol=1e-3, rtol=1e-3)

    # Reference 2: the f32 conv (semantics of the PyTorch module); looser
    # tolerance because the kernel uses bf16 operands.
    conv = jax.lax.conv_general_dilated(
        x, weight, window_strides=(P, P), padding="VALID",
        dimension_numbers=("NCHW", "OIHW", "NCHW"),
    ) + bias[None, :, None, None]
    ref_f32 = conv.reshape(B, E, -1).transpose(0, 2, 1)
    assert jnp.allclose(out, ref_f32, atol=3e-2, rtol=3e-2)

    print("KERNEL_OK")
</pallas_src>

<mosaic_0001>
module attributes {stable_mosaic.version = 11 : i64} {
  func.func @_patch_embed_kernel(%arg0: i32, %arg1: memref<8x256xbf16, #tpu.memory_space<vmem>>, %arg2: memref<256x128xbf16, #tpu.memory_space<vmem>>, %arg3: memref<1x128xf32, #tpu.memory_space<vmem>>, %arg4: memref<8x128xf32, #tpu.memory_space<vmem>>) attributes {dimension_semantics = [#tpu.dimension_semantics<parallel>], iteration_bounds = array<i64: 1>, scalar_prefetch = 0 : i64, scratch_operands = 0 : i64, tpu.core_type = #tpu.core_type<tc>, window_params = [{transform_indices = @transform_0, window_bounds = array<i64: 8, 256>}, {pipeline_mode = #tpu.pipeline_mode<synchronous>, transform_indices = @transform_1, window_bounds = array<i64: 256, 128>}, {pipeline_mode = #tpu.pipeline_mode<synchronous>, transform_indices = @transform_2, window_bounds = array<i64: 1, 128>}, {transform_indices = @transform_3, window_bounds = array<i64: 8, 128>}]} {
    %c0 = arith.constant 0 : index
    %c0_0 = arith.constant 0 : index
    %0 = vector.load %arg1[%c0, %c0_0] : memref<8x256xbf16, #tpu.memory_space<vmem>>, vector<8x256xbf16>
    %c0_1 = arith.constant 0 : index
    %c0_2 = arith.constant 0 : index
    %1 = vector.load %arg2[%c0_1, %c0_2] : memref<256x128xbf16, #tpu.memory_space<vmem>>, vector<256x128xbf16>
    %cst = arith.constant dense<0.000000e+00> : vector<8x128xf32>
    %2 = tpu.matmul %0, %1, %cst {dimension_numbers = #tpu.dot_dimension_numbers<[1], [0], [0], [1], [0, 0, 1, 1], [], []>} : vector<8x256xbf16>, vector<256x128xbf16>, vector<8x128xf32> -> vector<8x128xf32>
    %c0_3 = arith.constant 0 : index
    %c0_4 = arith.constant 0 : index
    %3 = vector.load %arg3[%c0_3, %c0_4] : memref<1x128xf32, #tpu.memory_space<vmem>>, vector<1x128xf32>
    %4 = vector.broadcast %3 : vector<1x128xf32> to vector<8x128xf32>
    %5 = arith.addf %2, %4 : vector<8x128xf32>
    %c0_5 = arith.constant 0 : index
    %c0_6 = arith.constant 0 : index
    %6 = vector.load %arg4[%c0_5, %c0_6] : memref<8x128xf32, #tpu.memory_space<vmem>>, vector<8x128xf32>
    tpu.vector_store %arg4[%c0_5, %c0_6], %5 {strides = array<i32>} : memref<8x128xf32, #tpu.memory_space<vmem>>, vector<8x128xf32>,
    return
  }
  func.func @transform_0(%arg0: i32) -> (i32, i32) {
    %c0_i32 = arith.constant 0 : i32
    %c0_i32_0 = arith.constant 0 : i32
    return %arg0, %c0_i32 : i32, i32
  }
  func.func @transform_1(%arg0: i32) -> (i32, i32) {
    %c0_i32 = arith.constant 0 : i32
    %c0_i32_0 = arith.constant 0 : i32
    %c0_i32_1 = arith.constant 0 : i32
    return %c0_i32, %c0_i32_0 : i32, i32
  }
  func.func @transform_2(%arg0: i32) -> (i32, i32) {
    %c0_i32 = arith.constant 0 : i32
    %c0_i32_0 = arith.constant 0 : i32
    %c0_i32_1 = arith.constant 0 : i32
    return %c0_i32, %c0_i32_0 : i32, i32
  }
  func.func @transform_3(%arg0: i32) -> (i32, i32) {
    %c0_i32 = arith.constant 0 : i32
    %c0_i32_0 = arith.constant 0 : i32
    return %arg0, %c0_i32 : i32, i32
  }
}

</mosaic_0001>

<bundles_post_ra>
// kernel: tpu_custom_call.1
= control target key start
LH: loop header
LB: loop body
LE: loop exit
PB: predicated region body
PF: predicated region fallthrough
CT: control target
= control target key end

     0   :  { %8 = vsyncpa [#allocation3], 0  ;;  %s449_s0 = inlined_call_operand.hbm [shape: bf16[8,256], index: 0, kind: input, shape index: {}]   ;;  %s450_s1 = inlined_call_operand.hbm [shape: bf16[256,128], index: 1, kind: input, shape index: {}]   ;;  %s451_s2 = inlined_call_operand.vmem [shape: f32[1,128], index: 2, kind: input, shape index: {}]   ;;  %s452_s3 = inlined_call_operand.hbm [shape: f32[8,128], index: 3, kind: output, shape index: {}]  }
   0x1   :  { %9 = vsyncpa [#allocation6], 0 }
   0x2   :  { %10 = vsyncpa [#allocation4], 0  ;;  %s378_s12 = smov [#allocation2]   ;;  %s379_s14 = smov [#allocation5]  }
   0x3   :  { %s17_s13 = sshll.u32 %s378_s12, 4  ;;  %s26_s15 = sshll.u32 %s379_s14, 4  ;;  %s18_s13 = int_to_ptr.vmem [resolvable:$true] %s17_s13  ;;  %s403_s15 = int_to_ptr.vmem [resolvable:$true] %s26_s15 }
   0x4   :  { %s306_s18 = scalar_lea.hbm %s449_s0, 128 }
   0x5   :  { %p307_p0 = scmp.ne.s32.totalorder %s449_s0, %s306_s18  ;;  %p310_p1 = scmp.lt.u32.totalorder %s306_s18, %s449_s0 }
   0x7   :  { %p312_p2 = pnand %p310_p1, %p307_p0 }
   0x9   :  { %315 = shalt.err (!%p312_p2)
}
   0xa   :  { %s316_s23 = scalar_lea.vmem %s18_s13, 128  ;;  %p321_p4 = scmp.lt.s32.totalorder %s18_s13, %s18_s13 }
   0xb   :  { %p317_p3 = scmp.ne.s32.totalorder %s18_s13, %s316_s23  ;;  %p322_p5 = scmp.lt.s32.totalorder %s316_s23, %s316_s23 }
   0xd   :  { %p323_p6 = por %p322_p5, %p321_p4 }
   0xf   :  { %p324_p7 = pnand %p323_p6, %p317_p3 }
  0x11   :  { %327 = shalt.err (!%p324_p7)
}
  0x12   :  { %20 = dma.hbm_to_vmem [thread:$0]  %s449_s0, 128, %s18_s13, [#allocation3]  }
  0x13   :  { %s328_s28 = scalar_lea.hbm %s450_s1, 2048 }
  0x14   :  { %p329_p8 = scmp.ne.s32.totalorder %s450_s1, %s328_s28  ;;  %p332_p9 = scmp.lt.u32.totalorder %s328_s28, %s450_s1 }
  0x16   :  { %p334_p10 = pnand %p332_p9, %p329_p8 }
  0x18   :  { %337 = shalt.err (!%p334_p10)
}
  0x19   :  { %s338_s6 = scalar_lea.vmem %s403_s15, 2048  ;;  %p343_p12 = scmp.lt.s32.totalorder %s403_s15, %s403_s15 }
  0x1a   :  { %p339_p11 = scmp.ne.s32.totalorder %s403_s15, %s338_s6  ;;  %p344_p13 = scmp.lt.s32.totalorder %s338_s6, %s338_s6 }
  0x1c   :  { %p345_p0 = por %p344_p13, %p343_p12 }
  0x1e   :  { %p346_p1 = pnand %p345_p0, %p339_p11 }
  0x20   :  { %349 = shalt.err (!%p346_p1)
}
  0x21   :  { %s380_s0 = smov 64   ;;  %s381_s7 = smov 4  }
  0x22   :  { %32 = dma.hbm_to_vmem [thread:$0]  %s450_s1, 2048, %s403_s15, [#allocation6], %s380_s0, %s380_s0, %s381_s7  }
  0x23   :  { %372 = dma.done.wait [#allocation3], 128  }
  0x24   :  { %373 = vsyncadd [#allocation3], 4294967168 }
  0x25   :  { %374 = dma.done.wait [#allocation6], 2048  }
  0x26   :  { %375 = vsyncadd [#allocation6], 4294965248  ;;  %v288_v0 = vld [vmem:[#allocation5 + $0x40] sm:$0xff]   ;;  %v290_v2 = vld [vmem:[#allocation5 + $0x48] sm:$0xff]   ;;  %s382_s11 = smov [#allocation7]  }
  0x27   :  { %v289_v1 = vld [vmem:[#allocation5] sm:$0xff]   ;;  %261 = vmatprep.subr.bf16.mxu0 %v288_v0  ;;  %v291_v3 = vld [vmem:[#allocation5 + $0x8] sm:$0xff]   ;;  %v292_v4 = vld [vmem:[#allocation5 + $0x50] sm:$0xff]   ;;  %s232_s12 = sshll.u32 %s382_s11, 4  ;;  %s233_s12 = int_to_ptr.vmem [resolvable:$true] %s232_s12 }
  0x28   :  { %262 = vmatpush3.bf16.msra.mxu0 %v289_v1  ;;  %v293_v5 = vld [vmem:[#allocation5 + $0x10] sm:$0xff]   ;;  %v294_v6 = vld [vmem:[#allocation5 + $0x58] sm:$0xff]   ;;  %v296_v8 = vld [vmem:[#allocation5 + $0x60] sm:$0xff]   ;;  %s350_s13 = scalar_lea.vmem %s233_s12, 128  ;;  %p355_p3 = scmp.lt.s32.totalorder %s233_s12, %s233_s12 }
  0x29   :  { %263 = vmatprep.subr.bf16.mxu0 %v290_v2  ;;  %v295_v7 = vld [vmem:[#allocation5 + $0x18] sm:$0xff]   ;;  %v297_v9 = vld [vmem:[#allocation5 + $0x20] sm:$0xff]   ;;  %v298_v10 = vld [vmem:[#allocation5 + $0x68] sm:$0xff]   ;;  %p351_p2 = scmp.ne.s32.totalorder %s233_s12, %s350_s13  ;;  %p356_p4 = scmp.lt.s32.totalorder %s350_s13, %s350_s13 }
  0x2a   :  { %v42_v11 = vld [vmem:[#allocation2] sm:$0xff]  ;;  %v299_v13 = vld [vmem:[#allocation5 + $0x28] sm:$0xff]   ;;  %v300_v14 = vld [vmem:[#allocation5 + $0x70] sm:$0xff]  }
  0x2b   :  { %v244_v12 = vcombine.high %v42_v11, %v42_v11  ;;  %v301_v15 = vld [vmem:[#allocation5 + $0x30] sm:$0xff]   ;;  %v302_v16 = vld [vmem:[#allocation5 + $0x78] sm:$0xff]   ;;  %v243_v18 = vcombine.low %v42_v11, %v42_v11  ;;  %p357_p5 = por %p356_p4, %p355_p3 }
  0x2c   :  { %264 = vmatpush3.bf16.msra.mxu0 %v291_v3  ;;  %v303_v17 = vld [vmem:[#allocation5 + $0x38] sm:$0xff]  }
  0x2d   :  { %265 = vmatprep.subr.bf16.mxu0 %v292_v4  ;;  %217 = vmatprep.mubr.bf16.mxu0 %v244_v12  ;;  %v242_v20 = vld [vmem:[%s451_s2] ss:$0 sm:$0xff]  ;;  %p358_p6 = pnand %p357_p5, %p351_p2 }
  0x30   :  { %266 = vmatpush3.bf16.msra.mxu0 %v293_v5 }
  0x31   :  { %267 = vmatprep.subr.bf16.mxu0 %v294_v6 }
  0x34   :  { %268 = vmatpush3.bf16.msra.mxu0 %v295_v7 }
  0x35   :  { %269 = vmatprep.subr.bf16.mxu0 %v296_v8 }
  0x38   :  { %270 = vmatpush3.bf16.msra.mxu0 %v297_v9 }
  0x39   :  { %271 = vmatprep.subr.bf16.mxu0 %v298_v10 }
  0x3c   :  { %272 = vmatpush3.bf16.msra.mxu0 %v299_v13 }
  0x3d   :  { %273 = vmatprep.subr.bf16.mxu0 %v300_v14 }
  0x40   :  { %274 = vmatpush3.bf16.msra.mxu0 %v301_v15 }
  0x41   :  { %275 = vmatprep.subr.bf16.mxu0 %v302_v16 }
  0x44   :  { %276 = vmatpush3.bf16.msra.mxu0 %v303_v17 }
  0x47   :  { %218 = vmatmul.mubr.bf16.vlgmr.msra.gmra.mrb[0].mxu0 %v243_v18 }
 0x11a   :  { %v277_v19 = vpop.f32.mrb[0].mxu0 }
 0x11b   :  { %v278_v21 = vpop.f32.mrb[1].mxu0 }
 0x11c   :  { %v279_v22 = vadd.f32 %v278_v21, %v277_v19  ;;  %v280_v23 = vpop.f32.mrb[2].mxu0 }
 0x11d   :  { %v281_v24 = vpop.f32.mrb[3].mxu0 }
 0x11e   :  { %v220_v25 = vadd.f32 %v279_v22, %v242_v20 }
 0x120   :  { %225 = vst [vmem:[#allocation7] sm:$0xff] %v220_v25 }
 0x121   :  { %361 = shalt.err (!%p358_p6)
}
 0x122   :  { %s362_s2 = scalar_lea.hbm %s452_s3, 128 }
 0x123   :  { %p363_p7 = scmp.ne.s32.totalorder %s452_s3, %s362_s2  ;;  %p366_p8 = scmp.lt.u32.totalorder %s362_s2, %s452_s3 }
 0x125   :  { %p368_p9 = pnand %p366_p8, %p363_p7 }
 0x127   :  { %371 = shalt.err (!%p368_p9)
}
 0x128   :  { %235 = dma.vmem_to_hbm [thread:$0]  %s233_s12, 128, %s452_s3, [#allocation4]  }
 0x129   :  { %376 = dma.done.wait [#allocation4], 128  }
 0x12a   :  { %377 = vsyncadd [#allocation4], 4294967168 }
 0x12b   :  { %239 = vsyncpa [#allocation3], 1 }
 0x12c   :  { %240 = vsyncpa [#allocation6], 1 }
 0x12d   :  { %241 = vsyncpa [#allocation4], 1 }

</bundles_post_ra>
